<compile_context>
chip_gen: v5e
topology: v5e:2x2
jax: 0.10.0
libtpu: 0.0.40
codegen_flags: <defaults>
</compile_context>

<pallas_src>
import functools

import jax
import jax.numpy as jnp
from jax import lax
from jax.experimental import pallas as pl
from jax.experimental.pallas import tpu as pltpu

LANES = 128
SUBLANES = 8
# Combined input HBM bytes moved per grid step (both operands together).
TARGET_STEP_BYTES = 8 * 1024 * 1024
# 2 inputs x 2 pipeline buffers x 4 MiB = 16 MiB < 32 MiB scoped limit below.
VMEM_LIMIT_BYTES = 32 * 1024 * 1024


def _round_down(x, m):
    return (x // m) * m


def _mse_partial_kernel(o_ref, l_ref, out_ref, *, row_tile, rows,
                        steps_per_core, mask_from, needs_mask):
    c = pl.program_id(0)   # core-split ("parallel") axis
    s = pl.program_id(1)   # streaming ("arbitrary" / reduction) axis

    @pl.when(s == 0)
    def _():
        out_ref[...] = jnp.zeros_like(out_ref)

    d = o_ref[...].astype(jnp.float32) - l_ref[...].astype(jnp.float32)
    d2 = d * d

    def partial_sum(x):
        # (row_tile, 128) -> (row_tile//8, 8, 128) is a relayout-free vreg
        # regrouping; the sum over the leading axis is pure VPU adds.
        return x.reshape(row_tile // SUBLANES, SUBLANES, LANES).sum(axis=0)

    if needs_mask:
        blk = c * steps_per_core + s

        # Fast path: full in-range blocks carry zero mask work.
        @pl.when(blk < mask_from)
        def _():
            out_ref[...] += partial_sum(d2)

        # Slow path: the single ragged last block and/or a clamped duplicate
        # block.  Keep this a SELECT so stale / unspecified VMEM rows from the
        # partial edge DMA can never leak into the sum.
        @pl.when(blk >= mask_from)
        def _():
            row_idx = blk * row_tile + lax.broadcasted_iota(
                jnp.int32, (row_tile, 1), 0)
            out_ref[...] += partial_sum(jnp.where(row_idx < rows, d2, 0.0))
    else:
        out_ref[...] += partial_sum(d2)


def mse_loss_pallas(output: jax.Array, label: jax.Array) -> jax.Array:
    assert output.shape == label.shape, "output/label must have identical shapes"
    n_elems = output.size

    o_flat = output.reshape(-1)
    l_flat = label.reshape(-1)

    # <128-element tail: summed in plain JAX on a tiny slice instead of
    # padding (and re-writing) both full arrays.
    rem = n_elems % LANES
    tail_sum = jnp.float32(0.0)
    if rem:
        o_tail = lax.slice(o_flat, (n_elems - rem,), (n_elems,))
        l_tail = lax.slice(l_flat, (n_elems - rem,), (n_elems,))
        dt = o_tail.astype(jnp.float32) - l_tail.astype(jnp.float32)
        tail_sum = jnp.sum(dt * dt)
        # TODO(synk): this leading slice may still materialize a copy; feed the
        # unpadded 1-D arrays and lane-mask the tail in-kernel to kill it.
        o_flat = lax.slice(o_flat, (0,), (n_elems - rem,))
        l_flat = lax.slice(l_flat, (0,), (n_elems - rem,))

    rows = (n_elems - rem) // LANES
    if rows == 0:
        # Fewer than 128 elements total: nothing left for the kernel.
        return tail_sum / n_elems

    o2d = o_flat.reshape(rows, LANES)
    l2d = l_flat.reshape(rows, LANES)

    itemsizes = (jnp.dtype(output.dtype).itemsize, jnp.dtype(label.dtype).itemsize)
    # Native packed sublane tiling: 8 rows (f32) / 16 (bf16) / 32 (int8/fp8).
    align = max(SUBLANES * max(1, 4 // it) for it in itemsizes)
    bytes_per_row = LANES * sum(itemsizes)
    target_rows = max(align, _round_down(TARGET_STEP_BYTES // bytes_per_row, align))
    row_tile = min(target_rows, max(align, _round_down(rows, align)))
    grid_steps = pl.cdiv(rows, row_tile)

    # Only split across the two-core axis when it is (nearly) free: an even
    # split, or enough steps that at most one clamped duplicate block is noise.
    # TODO(synk): verify the leading "parallel" axis actually shards across
    # both TensorCores on v7x (xprof); if not, switch to pltpu.CORE_PARALLEL /
    # pl.core_map(pltpu.create_tensorcore_mesh(...)).
    use_two_cores = grid_steps >= 2 and (grid_steps % 2 == 0 or grid_steps >= 8)
    ncores = 2 if use_two_cores else 1
    steps_per_core = pl.cdiv(grid_steps, ncores)
    has_dup = ncores * steps_per_core != grid_steps   # at most one clamped block
    ragged_rows = (rows % row_tile) != 0
    needs_mask = ragged_rows or has_dup
    mask_from = grid_steps - 1 if ragged_rows else grid_steps

    if has_dup:
        def in_index_map(c, s):
            # Clamp so the DMA stays in-bounds; the duplicated block's logical
            # row indices are >= rows and get masked to zero in the kernel.
            return (jnp.minimum(c * steps_per_core + s, grid_steps - 1), 0)
    else:
        def in_index_map(c, s):
            return (c * steps_per_core + s, 0)

    kernel = functools.partial(
        _mse_partial_kernel, row_tile=row_tile, rows=rows,
        steps_per_core=steps_per_core, mask_from=mask_from,
        needs_mask=needs_mask)

    in_bytes = o2d.size * itemsizes[0] + l2d.size * itemsizes[1]
    out_bytes = ncores * SUBLANES * LANES * 4

    partials = pl.pallas_call(
        kernel,
        out_shape=jax.ShapeDtypeStruct((ncores, SUBLANES, LANES), jnp.float32),
        grid_spec=pltpu.PrefetchScalarGridSpec(
            num_scalar_prefetch=0,
            grid=(ncores, steps_per_core),
            in_specs=[
                pl.BlockSpec((row_tile, LANES), in_index_map),
                pl.BlockSpec((row_tile, LANES), in_index_map),
            ],
            out_specs=pl.BlockSpec((None, SUBLANES, LANES),
                                   lambda c, s: (c, 0, 0)),
        ),
        compiler_params=pltpu.CompilerParams(
            dimension_semantics=("parallel", "arbitrary"),
            vmem_limit_bytes=VMEM_LIMIT_BYTES,
        ),
        cost_estimate=pl.CostEstimate(
            flops=3 * n_elems,
            transcendentals=0,
            bytes_accessed=in_bytes + out_bytes),
    )(o2d, l2d)

    # Tiny cross-lane reduction + mean scaling in plain JAX.
    # (float32(n) is inexact for n > 2^24 but far inside 1e-6 rtol.)
    return (jnp.sum(partials) + tail_sum) / n_elems


if __name__ == "__main__":
    key = jax.random.PRNGKey(0)

    def check(shape, k):
        k1, k2 = jax.random.split(k)
        o = jax.random.normal(k1, shape, dtype=jnp.float32)
        l = jax.random.normal(k2, shape, dtype=jnp.float32)
        loss = mse_loss_pallas(o, l)
        jax.block_until_ready(loss)
        ref = jnp.mean((o - l) ** 2)
        assert jnp.allclose(loss, ref, rtol=1e-6, atol=1e-6), (shape, loss, ref)

    k1, k2, k3 = jax.random.split(key, 3)
    # Small NCHW prediction/label pair consistent with the module's usage.
    check((2, 4, 16, 16), k1)   # aligned fast path (single block, no mask)
    check((4, 3, 128), k2)      # ragged row count: 2-step grid + masked last block
    check((3, 5, 7), k3)        # <128-element tail handled outside the kernel
    print("KERNEL_OK")
</pallas_src>

<mosaic_0001>
module attributes {stable_mosaic.version = 11 : i64} {
  func.func @_mse_partial_kernel(%arg0: i32, %arg1: i32, %arg2: memref<16x128xf32, #tpu.memory_space<vmem>>, %arg3: memref<16x128xf32, #tpu.memory_space<vmem>>, %arg4: memref<1x8x128xf32, #tpu.memory_space<vmem>>) attributes {dimension_semantics = [#tpu.dimension_semantics<parallel>, #tpu.dimension_semantics<arbitrary>], iteration_bounds = array<i64: 1, 1>, scalar_prefetch = 0 : i64, scratch_operands = 0 : i64, tpu.core_type = #tpu.core_type<tc>, window_params = [{transform_indices = @transform_0, window_bounds = array<i64: 16, 128>}, {transform_indices = @transform_1, window_bounds = array<i64: 16, 128>}, {transform_indices = @transform_2, window_bounds = array<i64: 1, 8, 128>}]} {
    %c0_i32 = arith.constant 0 : i32
    %0 = arith.cmpi eq, %arg1, %c0_i32 : i32
    %1 = arith.extui %0 : i1 to i32
    %c0_i32_0 = arith.constant 0 : i32
    %2 = arith.cmpi ne, %1, %c0_i32_0 : i32
    scf.if %2 {
      %cst_10 = arith.constant 0.000000e+00 : f32
      %15 = vector.broadcast %cst_10 : f32 to vector<8x128xf32>
      %c0_11 = arith.constant 0 : index
      %c0_12 = arith.constant 0 : index
      %c0_13 = arith.constant 0 : index
      %16 = vector.load %arg4[%c0_11, %c0_12, %c0_13] : memref<1x8x128xf32, #tpu.memory_space<vmem>>, vector<1x8x128xf32>
      %17 = vector.shape_cast %16 : vector<1x8x128xf32> to vector<8x128xf32>
      %18 = vector.shape_cast %15 : vector<8x128xf32> to vector<1x8x128xf32>
      tpu.vector_store %arg4[%c0_11, %c0_12, %c0_13], %18 {strides = array<i32>} : memref<1x8x128xf32, #tpu.memory_space<vmem>>, vector<1x8x128xf32>,
    } else {
    }
    %c0 = arith.constant 0 : index
    %c0_1 = arith.constant 0 : index
    %3 = vector.load %arg2[%c0, %c0_1] : memref<16x128xf32, #tpu.memory_space<vmem>>, vector<16x128xf32>
    %c0_2 = arith.constant 0 : index
    %c0_3 = arith.constant 0 : index
    %4 = vector.load %arg3[%c0_2, %c0_3] : memref<16x128xf32, #tpu.memory_space<vmem>>, vector<16x128xf32>
    %5 = arith.subf %3, %4 : vector<16x128xf32>
    %6 = arith.mulf %5, %5 : vector<16x128xf32>
    %c0_4 = arith.constant 0 : index
    %c0_5 = arith.constant 0 : index
    %c0_6 = arith.constant 0 : index
    %7 = vector.load %arg4[%c0_4, %c0_5, %c0_6] : memref<1x8x128xf32, #tpu.memory_space<vmem>>, vector<1x8x128xf32>
    %8 = vector.shape_cast %7 : vector<1x8x128xf32> to vector<8x128xf32>
    %9 = vector.shape_cast %6 : vector<16x128xf32> to vector<2x8x128xf32>
    %cst = arith.constant dense<0.000000e+00> : vector<8x128xf32>
    %10 = vector.multi_reduction <add>, %9, %cst [0] : vector<2x8x128xf32> to vector<8x128xf32>
    %11 = arith.addf %8, %10 : vector<8x128xf32>
    %c0_7 = arith.constant 0 : index
    %c0_8 = arith.constant 0 : index
    %c0_9 = arith.constant 0 : index
    %12 = vector.load %arg4[%c0_7, %c0_8, %c0_9] : memref<1x8x128xf32, #tpu.memory_space<vmem>>, vector<1x8x128xf32>
    %13 = vector.shape_cast %12 : vector<1x8x128xf32> to vector<8x128xf32>
    %14 = vector.shape_cast %11 : vector<8x128xf32> to vector<1x8x128xf32>
    tpu.vector_store %arg4[%c0_7, %c0_8, %c0_9], %14 {strides = array<i32>} : memref<1x8x128xf32, #tpu.memory_space<vmem>>, vector<1x8x128xf32>,
    return
  }
  func.func @transform_0(%arg0: i32, %arg1: i32) -> (i32, i32) {
    %c1_i32 = arith.constant 1 : i32
    %0 = arith.muli %arg0, %c1_i32 : i32
    %1 = arith.addi %0, %arg1 : i32
    %c0_i32 = arith.constant 0 : i32
    %c0_i32_0 = arith.constant 0 : i32
    return %1, %c0_i32 : i32, i32
  }
  func.func @transform_1(%arg0: i32, %arg1: i32) -> (i32, i32) {
    %c1_i32 = arith.constant 1 : i32
    %0 = arith.muli %arg0, %c1_i32 : i32
    %1 = arith.addi %0, %arg1 : i32
    %c0_i32 = arith.constant 0 : i32
    %c0_i32_0 = arith.constant 0 : i32
    return %1, %c0_i32 : i32, i32
  }
  func.func @transform_2(%arg0: i32, %arg1: i32) -> (i32, i32, i32) {
    %c0_i32 = arith.constant 0 : i32
    %c0_i32_0 = arith.constant 0 : i32
    %c0_i32_1 = arith.constant 0 : i32
    return %arg0, %c0_i32, %c0_i32_0 : i32, i32, i32
  }
}

</mosaic_0001>

<bundles_post_ra>
// kernel: tpu_custom_call.1
= control target key start
LH: loop header
LB: loop body
LE: loop exit
PB: predicated region body
PF: predicated region fallthrough
CT: control target
= control target key end

     0   :  { %7 = vsyncpa [#allocation3], 0  ;;  %s204_s0 = inlined_call_operand.hbm [shape: f32[16,128], index: 0, kind: input, shape index: {}]   ;;  %s205_s1 = inlined_call_operand.hbm [shape: f32[16,128], index: 1, kind: input, shape index: {}]   ;;  %s206_s2 = inlined_call_operand.hbm [shape: f32[1,8,128], index: 2, kind: output, shape index: {}]  }
   0x1   :  { %8 = vsyncpa [#allocation6], 0 }
   0x2   :  { %9 = vsyncpa [#allocation4], 0  ;;  %s18_s11 = sshll.u32 %s204_s0, 4  ;;  %s175_s12 = smov [#allocation2]   ;;  %s19_s11 = int_to_ptr.hbm [resolvable:$true] %s18_s11 }
   0x3   :  { %s20_s13 = sshll.u32 %s175_s12, 4  ;;  %s35_s16 = sshll.u32 %s205_s1, 4  ;;  %s21_s13 = int_to_ptr.vmem [resolvable:$true] %s20_s13  ;;  %s36_s16 = int_to_ptr.hbm [resolvable:$true] %s35_s16 }
   0x4   :  { %s176_s17 = smov 128   ;;  %s177_s18 = smov 8  }
   0x5   :  { %26 = dma.hbm_to_vmem [thread:$0]  %s19_s11, 256, %s21_s13, [#allocation3], %s176_s17, %s176_s17, %s177_s18  }
   0x6   :  { %s178_s19 = smov [#allocation5]  }
   0x7   :  { %s37_s20 = sshll.u32 %s178_s19, 4  ;;  %s38_s20 = int_to_ptr.vmem [resolvable:$true] %s37_s20 }
   0x8   :  { %43 = dma.hbm_to_vmem [thread:$0]  %s36_s16, 256, %s38_s20, [#allocation6], %s176_s17, %s176_s17, %s177_s18  }
   0x9   :  { %169 = dma.done.wait [#allocation3], 256  }
   0xa   :  { %170 = vsyncadd [#allocation3], 4294967040 }
   0xb   :  { %171 = dma.done.wait [#allocation6], 256  }
   0xc   :  { %172 = vsyncadd [#allocation6], 4294967040  ;;  %v61_v0 = vld [vmem:[#allocation2] sm:$0xff]  ;;  %v62_v1 = vld [vmem:[#allocation2 + $0x8] sm:$0xff]  ;;  %s179_s0 = smov [#allocation7]   ;;  %s80_s23 = sshll.u32 %s206_s2, 4  ;;  %s81_s23 = int_to_ptr.hbm [resolvable:$true] %s80_s23 }
   0xd   :  { %v63_v2 = vld [vmem:[#allocation5] sm:$0xff]  ;;  %v64_v3 = vld [vmem:[#allocation5 + $0x8] sm:$0xff]  ;;  %s78_s1 = sshll.u32 %s179_s0, 4  ;;  %s79_s1 = int_to_ptr.vmem [resolvable:$true] %s78_s1 }
   0xe   :  { %v65_v4 = vsub.f32 %v61_v0, %v63_v2  ;;  %v66_v5 = vsub.f32 %v62_v1, %v64_v3 }
  0x10   :  { %v67_v6 = vmul.f32 %v65_v4, %v65_v4  ;;  %v68_v7 = vmul.f32 %v66_v5, %v66_v5 }
  0x12   :  { %v70_v8 = vadd.f32 %v68_v7, %v67_v6 }
  0x14   :  { %72 = vst [vmem:[#allocation7] sm:$0xff] %v70_v8 }
  0x15   :  { %83 = dma.vmem_to_hbm [thread:$0]  %s79_s1, 128, %s81_s23, [#allocation4]  }
  0x16   :  { %173 = dma.done.wait [#allocation4], 128  }
  0x17   :  { %174 = vsyncadd [#allocation4], 4294967168 }
  0x18   :  { %88 = vsyncpa [#allocation3], 1 }
  0x19   :  { %89 = vsyncpa [#allocation6], 1 }
  0x1a   :  { %90 = vsyncpa [#allocation4], 1 }

</bundles_post_ra>
